<compile_context>
chip_gen: v7x
topology: tpu7x:2x2x1
jax: 0.10.0
libtpu: 0.0.40
codegen_flags: <defaults>
</compile_context>

<pallas_src>
import numpy as np
import jax
import jax.numpy as jnp
from jax import lax
from jax.experimental import pallas as pl
from jax.experimental.pallas import tpu as pltpu

EMBEDDING_DIM = 512
DROPOUT_RATE = 0.1  # eval mode: dropout is identity


def _choose_q_tile(T):
    # 256 fills the 2x256^2 MXUs on v6e/v7x; on v5e (4x128^2 MXU) pass
    # q_tile=128 explicitly — larger tiles buy nothing there.
    for t in (256, 128, 64, 32, 16, 8):
        if t <= T and T % t == 0:
            return t
    return T


def _head_kernel(x_ref, wqkv_ref, out_ref, k_bf, v_bf):
    # x_ref:     (1, tq, C)  f32  -- this q-tile's rows of x (per-step DMA)
    # wqkv_ref:  (C, 3H)     bf16 -- fused [Wq^T | Wk^T | Wv^T], grid-invariant
    # out_ref:   (1, tq, 3H) f32  -- lane-dense slab [attn_out | k | v] for this tile
    # k_bf/v_bf: (T, H)      bf16 -- key/value MXU-input scratch, filled tile-by-tile
    i = pl.program_id(1)
    tq = out_ref.shape[1]
    H = k_bf.shape[1]
    row0 = pl.multiple_of(i * tq, tq)

    # ---- incremental fused projection of this tile's rows ---------------------
    x = x_ref[0].astype(jnp.bfloat16)                                     # (tq, C)
    qkv = jnp.dot(x, wqkv_ref[...], preferred_element_type=jnp.float32)   # (tq, 3H) f32
    q_f = qkv[:, :H]
    k_f = qkv[:, H:2 * H]
    v_f = qkv[:, 2 * H:]

    # bf16 copies for the MXU, written once per row (no per-step (T,H) re-casts).
    k16 = k_f.astype(jnp.bfloat16)
    v16 = v_f.astype(jnp.bfloat16)
    k_bf[pl.ds(row0, tq), :] = k16
    v_bf[pl.ds(row0, tq), :] = v16

    # f32 k/v cache rows go straight to the output slab (no concat temp,
    # direct lane-slice stores).
    out_ref[0, :, H:2 * H] = k_f.astype(out_ref.dtype)
    out_ref[0, :, 2 * H:] = v_f.astype(out_ref.dtype)

    # Scale q (tq*H elements) instead of scores; bf16 input for the MXU.
    q = (q_f * (H ** -0.5)).astype(jnp.bfloat16)                          # (tq, H)

    # ---- causal attention over visible k-tiles 0..i ----------------------------
    # Diagonal tile first: the only one needing the iota mask; initializes the
    # online-softmax state with finite row maxima (diag is always unmasked).
    s = lax.dot_general(q, k16, (((1,), (1,)), ((), ())),
                        preferred_element_type=jnp.float32)               # (tq, tq)
    r_idx = lax.broadcasted_iota(jnp.int32, (tq, tq), 0)
    c_idx = lax.broadcasted_iota(jnp.int32, (tq, tq), 1)
    s = jnp.where(r_idx >= c_idx, s, -1e30)
    m = jnp.max(s, axis=-1, keepdims=True)                                # (tq, 1)
    p = jnp.exp(s - m)
    l = jnp.sum(p, axis=-1, keepdims=True)                                # (tq, 1)
    acc = jnp.dot(p.astype(jnp.bfloat16), v16,
                  preferred_element_type=jnp.float32)                     # (tq, H)

    def body(j, carry):
        m, l, acc = carry
        off = pl.multiple_of(j * tq, tq)
        kb = k_bf[pl.ds(off, tq), :]                                      # (tq, H) bf16
        vb = v_bf[pl.ds(off, tq), :]
        s = lax.dot_general(q, kb, (((1,), (1,)), ((), ())),
                            preferred_element_type=jnp.float32)           # (tq, tq)
        m_new = jnp.maximum(m, jnp.max(s, axis=-1, keepdims=True))
        a = jnp.exp(m - m_new)
        p = jnp.exp(s - m_new)
        l = a * l + jnp.sum(p, axis=-1, keepdims=True)
        acc = a * acc + jnp.dot(p.astype(jnp.bfloat16), vb,
                                preferred_element_type=jnp.float32)
        return m_new, l, acc

    # Strictly-below-diagonal tiles: fully unmasked, no iota/where/fill work.
    # Dynamic trip count (= i); fully-masked tiles are never touched.
    m, l, acc = lax.fori_loop(0, i, body, (m, l, acc))

    # TODO(synk): dropout on the attention probs skipped (eval mode).
    out = acc * pl.reciprocal(l, approx=True)                             # EUP slot
    out_ref[0, :, :H] = out.astype(out_ref.dtype)


def head_forward(x, wq_t, wk_t, wv_t, mask=None, cache_k=None, cache_v=None,
                 q_tile=None):
    """Pallas-backed forward of `Head` (eval mode, causal mask).

    x:    (B, T, C) float32
    w*_t: (C, H) float32 -- transposed nn.Linear weights (y = x @ W^T)
    mask: only the causal (lower-triangular) mask is supported; a concrete
          non-causal mask raises NotImplementedError.
    Returns (out, updated_cache_k, updated_cache_v), each (B, T, H).
    """
    assert cache_k is None and cache_v is None, "cache path not exercised here"
    B, T, C = x.shape
    H = wq_t.shape[1]
    tq = q_tile if q_tile is not None else _choose_q_tile(T)
    assert T % tq == 0

    if mask is not None:
        # Reject a concrete non-causal mask instead of silently ignoring it.
        m_np = None
        try:
            m_np = np.asarray(mask)
        except Exception:
            m_np = None  # traced mask: assume causal
        if m_np is not None:
            causal = np.tril(np.ones((T, T), dtype=bool))
            if not np.array_equal(np.asarray(m_np[:T, :T] != 0), causal):
                raise NotImplementedError(
                    "only the causal (lower-triangular) mask is supported in-kernel")

    # Fused bf16 projection weight: (C, 3H) = [Wq^T | Wk^T | Wv^T].
    wqkv = jnp.concatenate([wq_t, wk_t, wv_t], axis=1).astype(jnp.bfloat16)

    grid = (B, T // tq)
    out_shape = jax.ShapeDtypeStruct((B, T, 3 * H), x.dtype)

    grid_spec = pltpu.PrefetchScalarGridSpec(
        num_scalar_prefetch=0,
        grid=grid,
        in_specs=[
            # Per-tile x block: 2*tq*C*4 bytes double-buffered (vs 2*T*C*4 before).
            pl.BlockSpec((1, tq, C), lambda b, i: (b, i, 0)),
            # Grid-invariant fused weight (C*3H bf16 ~= 192 KiB).
            pl.BlockSpec((C, 3 * H), lambda b, i: (0, 0)),
        ],
        out_specs=pl.BlockSpec((1, tq, 3 * H), lambda b, i: (b, i, 0)),
        scratch_shapes=[
            pltpu.VMEM((T, H), jnp.bfloat16),   # k (MXU input), filled tile-by-tile
            pltpu.VMEM((T, H), jnp.bfloat16),   # v (MXU input), filled tile-by-tile
        ],
    )

    n_tiles = T // tq
    visible = n_tiles * (n_tiles + 1) // 2       # causal: only lower-triangular tiles
    flops = (2 * B * T * C * 3 * H               # fused projection
             + 4 * B * H * tq * tq * visible)    # score + PV matmuls on visible tiles
    cost = pl.CostEstimate(
        flops=int(flops),
        transcendentals=int(B * tq * tq * visible),
        bytes_accessed=int(B * T * C * 4 + C * 3 * H * 2 + B * T * 3 * H * 4),
    )

    # NOTE(v7x): B >= 2 lets the "parallel" batch axis feed both TensorCores;
    # the i axis carries the k/v scratch and must stay "arbitrary".
    slab = pl.pallas_call(
        _head_kernel,
        out_shape=out_shape,
        grid_spec=grid_spec,
        compiler_params=pltpu.CompilerParams(
            dimension_semantics=("parallel", "arbitrary")),
        cost_estimate=cost,
    )(x, wqkv)

    out = slab[..., :H]
    k = slab[..., H:2 * H]
    v = slab[..., 2 * H:]
    return out, k, v


def _reference(x, wq_t, wk_t, wv_t):
    # Pure-JAX reference mirroring the kernel math (bf16 MXU inputs, f32 accum,
    # f32 softmax), eval mode, causal mask.
    xb = x.astype(jnp.bfloat16)
    q = jnp.dot(xb, wq_t.astype(jnp.bfloat16), preferred_element_type=jnp.float32)
    k = jnp.dot(xb, wk_t.astype(jnp.bfloat16), preferred_element_type=jnp.float32)
    v = jnp.dot(xb, wv_t.astype(jnp.bfloat16), preferred_element_type=jnp.float32)
    H = q.shape[-1]
    T = x.shape[1]
    qs = (q * (H ** -0.5)).astype(jnp.bfloat16)
    scores = jnp.einsum('bqh,bkh->bqk', qs, k.astype(jnp.bfloat16),
                        preferred_element_type=jnp.float32)
    causal = jnp.tril(jnp.ones((T, T), dtype=bool))
    scores = jnp.where(causal, scores, -1e30)
    probs = jax.nn.softmax(scores, axis=-1)
    out = jnp.einsum('bqk,bkh->bqh', probs.astype(jnp.bfloat16),
                     v.astype(jnp.bfloat16), preferred_element_type=jnp.float32)
    return out, k, v


if __name__ == "__main__":
    key = jax.random.PRNGKey(0)
    B, T, C, H = 2, 64, EMBEDDING_DIM, 64   # small seq / head_dim, C fixed by module

    kx, kq, kk, kv = jax.random.split(key, 4)
    x = jax.random.normal(kx, (B, T, C), dtype=jnp.float32)
    # nn.Linear(512, H) weight is (H, 512); store the transpose (512, H).
    bound = 1.0 / (C ** 0.5)
    wq_t = jax.random.uniform(kq, (C, H), jnp.float32, -bound, bound)
    wk_t = jax.random.uniform(kk, (C, H), jnp.float32, -bound, bound)
    wv_t = jax.random.uniform(kv, (C, H), jnp.float32, -bound, bound)

    # Module-style causal mask (verified in the wrapper; generated in-kernel).
    mask = jnp.tril(jnp.ones((T, T), dtype=jnp.int32))

    # q_tile=16 => 4 q-tiles per batch: exercises incremental projection, the
    # flash-style below-diagonal loop, and the diagonal-mask path.
    out, ck, cv = head_forward(x, wq_t, wk_t, wv_t, mask, q_tile=16)
    jax.block_until_ready((out, ck, cv))

    ref_out, ref_k, ref_v = _reference(x, wq_t, wk_t, wv_t)
    assert jnp.allclose(out, ref_out, atol=2e-2, rtol=2e-2), \
        float(jnp.max(jnp.abs(out - ref_out)))
    assert jnp.allclose(ck, ref_k, atol=1e-2, rtol=1e-2)
    assert jnp.allclose(cv, ref_v, atol=1e-2, rtol=1e-2)

    print("KERNEL_OK")
</pallas_src>

<mosaic_0001>
module attributes {stable_mosaic.version = 11 : i64} {
  func.func @_head_kernel(%arg0: i32, %arg1: i32, %arg2: memref<1x16x512xf32, #tpu.memory_space<vmem>>, %arg3: memref<512x192xbf16, #tpu.memory_space<vmem>>, %arg4: memref<1x16x192xf32, #tpu.memory_space<vmem>>, %arg5: memref<64x64xbf16, #tpu.memory_space<vmem>>, %arg6: memref<64x64xbf16, #tpu.memory_space<vmem>>) attributes {dimension_semantics = [#tpu.dimension_semantics<parallel>, #tpu.dimension_semantics<arbitrary>], iteration_bounds = array<i64: 2, 4>, scalar_prefetch = 0 : i64, scratch_operands = 2 : i64, tpu.core_type = #tpu.core_type<tc>, window_params = [{transform_indices = @transform_0, window_bounds = array<i64: 1, 16, 512>}, {pipeline_mode = #tpu.pipeline_mode<synchronous>, transform_indices = @transform_1, window_bounds = array<i64: 512, 192>}, {transform_indices = @transform_2, window_bounds = array<i64: 1, 16, 192>}]} {
    %c16_i32 = arith.constant 16 : i32
    %0 = arith.muli %arg1, %c16_i32 : i32
    %1 = tpu.assume_multiple %0, 16 : i32
    %c0 = arith.constant 0 : index
    %c0_0 = arith.constant 0 : index
    %c0_1 = arith.constant 0 : index
    %2 = vector.load %arg2[%c0, %c0_0, %c0_1] : memref<1x16x512xf32, #tpu.memory_space<vmem>>, vector<1x16x512xf32>
    %3 = vector.shape_cast %2 : vector<1x16x512xf32> to vector<16x512xf32>
    %4 = arith.truncf %3 : vector<16x512xf32> to vector<16x512xbf16>
    %c0_2 = arith.constant 0 : index
    %c0_3 = arith.constant 0 : index
    %5 = vector.load %arg3[%c0_2, %c0_3] : memref<512x192xbf16, #tpu.memory_space<vmem>>, vector<512x192xbf16>
    %cst = arith.constant dense<0.000000e+00> : vector<16x192xf32>
    %6 = tpu.matmul %4, %5, %cst {dimension_numbers = #tpu.dot_dimension_numbers<[1], [0], [0], [1], [0, 0, 1, 1], [], []>} : vector<16x512xbf16>, vector<512x192xbf16>, vector<16x192xf32> -> vector<16x192xf32>
    %7 = vector.extract_strided_slice %6 {offsets = [0, 0], sizes = [16, 64], strides = [1, 1]} : vector<16x192xf32> to vector<16x64xf32>
    %8 = vector.extract_strided_slice %6 {offsets = [0, 64], sizes = [16, 64], strides = [1, 1]} : vector<16x192xf32> to vector<16x64xf32>
    %9 = vector.extract_strided_slice %6 {offsets = [0, 128], sizes = [16, 64], strides = [1, 1]} : vector<16x192xf32> to vector<16x64xf32>
    %10 = arith.truncf %8 : vector<16x64xf32> to vector<16x64xbf16>
    %11 = arith.truncf %9 : vector<16x64xf32> to vector<16x64xbf16>
    %12 = arith.index_cast %1 : i32 to index
    %c0_4 = arith.constant 0 : index
    %13 = vector.load %arg5[%12, %c0_4] : memref<64x64xbf16, #tpu.memory_space<vmem>>, vector<16x64xbf16>
    tpu.vector_store %arg5[%12, %c0_4], %10 {strides = array<i32>} : memref<64x64xbf16, #tpu.memory_space<vmem>>, vector<16x64xbf16>,
    %14 = arith.index_cast %1 : i32 to index
    %c0_5 = arith.constant 0 : index
    %15 = vector.load %arg6[%14, %c0_5] : memref<64x64xbf16, #tpu.memory_space<vmem>>, vector<16x64xbf16>
    tpu.vector_store %arg6[%14, %c0_5], %11 {strides = array<i32>} : memref<64x64xbf16, #tpu.memory_space<vmem>>, vector<16x64xbf16>,
    %c0_6 = arith.constant 0 : index
    %c0_7 = arith.constant 0 : index
    %c64 = arith.constant 64 : index
    %16 = vector.load %arg4[%c0_6, %c0_7, %c64] : memref<1x16x192xf32, #tpu.memory_space<vmem>>, vector<1x16x64xf32>
    %17 = vector.shape_cast %16 : vector<1x16x64xf32> to vector<16x64xf32>
    %18 = vector.shape_cast %8 : vector<16x64xf32> to vector<1x16x64xf32>
    tpu.vector_store %arg4[%c0_6, %c0_7, %c64], %18 {strides = array<i32>} : memref<1x16x192xf32, #tpu.memory_space<vmem>>, vector<1x16x64xf32>,
    %c0_8 = arith.constant 0 : index
    %c0_9 = arith.constant 0 : index
    %c128 = arith.constant 128 : index
    %19 = vector.load %arg4[%c0_8, %c0_9, %c128] : memref<1x16x192xf32, #tpu.memory_space<vmem>>, vector<1x16x64xf32>
    %20 = vector.shape_cast %19 : vector<1x16x64xf32> to vector<16x64xf32>
    %21 = vector.shape_cast %9 : vector<16x64xf32> to vector<1x16x64xf32>
    tpu.vector_store %arg4[%c0_8, %c0_9, %c128], %21 {strides = array<i32>} : memref<1x16x192xf32, #tpu.memory_space<vmem>>, vector<1x16x64xf32>,
    %cst_10 = arith.constant 1.250000e-01 : f32
    %22 = vector.broadcast %cst_10 : f32 to vector<16x64xf32>
    %23 = arith.mulf %7, %22 : vector<16x64xf32>
    %24 = arith.truncf %23 : vector<16x64xf32> to vector<16x64xbf16>
    %cst_11 = arith.constant dense<0.000000e+00> : vector<16x16xf32>
    %25 = tpu.matmul %24, %10, %cst_11 {dimension_numbers = #tpu.dot_dimension_numbers<[1], [1], [0], [0], [0, 0, 1, 0], [], []>} : vector<16x64xbf16>, vector<16x64xbf16>, vector<16x16xf32> -> vector<16x16xf32>
    %26 = tpu.iota {dimensions = array<i32: 0>} : vector<16x16xi32>
    %27 = tpu.iota {dimensions = array<i32: 1>} : vector<16x16xi32>
    %28 = arith.cmpi sge, %26, %27 : vector<16x16xi32>
    %cst_12 = arith.constant -1.000000e+30 : f32
    %29 = vector.broadcast %cst_12 : f32 to vector<16x16xf32>
    %30 = arith.select %28, %25, %29 : vector<16x16xi1>, vector<16x16xf32>
    %cst_13 = arith.constant dense<0xFF800000> : vector<16xf32>
    %31 = vector.multi_reduction <maximumf>, %30, %cst_13 [1] : vector<16x16xf32> to vector<16xf32>
    %32 = vector.shape_cast %31 : vector<16xf32> to vector<16x1xf32>
    %33 = vector.broadcast %32 : vector<16x1xf32> to vector<16x16xf32>
    %34 = arith.subf %30, %33 : vector<16x16xf32>
    %35 = math.exp %34 : vector<16x16xf32>
    %cst_14 = arith.constant dense<0.000000e+00> : vector<16xf32>
    %36 = vector.multi_reduction <add>, %35, %cst_14 [1] : vector<16x16xf32> to vector<16xf32>
    %37 = vector.shape_cast %36 : vector<16xf32> to vector<16x1xf32>
    %38 = arith.truncf %35 : vector<16x16xf32> to vector<16x16xbf16>
    %cst_15 = arith.constant dense<0.000000e+00> : vector<16x64xf32>
    %39 = tpu.matmul %38, %11, %cst_15 {dimension_numbers = #tpu.dot_dimension_numbers<[1], [0], [0], [1], [0, 0, 1, 1], [], []>} : vector<16x16xbf16>, vector<16x64xbf16>, vector<16x64xf32> -> vector<16x64xf32>
    %c0_i32 = arith.constant 0 : i32
    %40 = arith.subi %arg1, %c0_i32 : i32
    %41 = arith.addi %c0_i32, %40 : i32
    %c1_i32 = arith.constant 1 : i32
    %42:3 = scf.for %arg7 = %c0_i32 to %41 step %c1_i32 iter_args(%arg8 = %32, %arg9 = %37, %arg10 = %39) -> (vector<16x1xf32>, vector<16x1xf32>, vector<16x64xf32>)  : i32 {
      %c16_i32_19 = arith.constant 16 : i32
      %49 = arith.muli %arg7, %c16_i32_19 : i32
      %50 = tpu.assume_multiple %49, 16 : i32
      %51 = arith.index_cast %50 : i32 to index
      %c0_20 = arith.constant 0 : index
      %52 = vector.load %arg5[%51, %c0_20] : memref<64x64xbf16, #tpu.memory_space<vmem>>, vector<16x64xbf16>
      %53 = arith.index_cast %50 : i32 to index
      %c0_21 = arith.constant 0 : index
      %54 = vector.load %arg6[%53, %c0_21] : memref<64x64xbf16, #tpu.memory_space<vmem>>, vector<16x64xbf16>
      %cst_22 = arith.constant dense<0.000000e+00> : vector<16x16xf32>
      %55 = tpu.matmul %24, %52, %cst_22 {dimension_numbers = #tpu.dot_dimension_numbers<[1], [1], [0], [0], [0, 0, 1, 0], [], []>} : vector<16x64xbf16>, vector<16x64xbf16>, vector<16x16xf32> -> vector<16x16xf32>
      %cst_23 = arith.constant dense<0xFF800000> : vector<16xf32>
      %56 = vector.multi_reduction <maximumf>, %55, %cst_23 [1] : vector<16x16xf32> to vector<16xf32>
      %57 = vector.shape_cast %56 : vector<16xf32> to vector<16x1xf32>
      %58 = arith.maximumf %arg8, %57 : vector<16x1xf32>
      %59 = arith.subf %arg8, %58 : vector<16x1xf32>
      %60 = math.exp %59 : vector<16x1xf32>
      %61 = vector.broadcast %58 : vector<16x1xf32> to vector<16x16xf32>
      %62 = arith.subf %55, %61 : vector<16x16xf32>
      %63 = math.exp %62 : vector<16x16xf32>
      %64 = arith.mulf %60, %arg9 : vector<16x1xf32>
      %cst_24 = arith.constant dense<0.000000e+00> : vector<16xf32>
      %65 = vector.multi_reduction <add>, %63, %cst_24 [1] : vector<16x16xf32> to vector<16xf32>
      %66 = vector.shape_cast %65 : vector<16xf32> to vector<16x1xf32>
      %67 = arith.addf %64, %66 : vector<16x1xf32>
      %68 = vector.broadcast %60 : vector<16x1xf32> to vector<16x64xf32>
      %69 = arith.mulf %68, %arg10 : vector<16x64xf32>
      %70 = arith.truncf %63 : vector<16x16xf32> to vector<16x16xbf16>
      %cst_25 = arith.constant dense<0.000000e+00> : vector<16x64xf32>
      %71 = tpu.matmul %70, %54, %cst_25 {dimension_numbers = #tpu.dot_dimension_numbers<[1], [0], [0], [1], [0, 0, 1, 1], [], []>} : vector<16x16xbf16>, vector<16x64xbf16>, vector<16x64xf32> -> vector<16x64xf32>
      %72 = arith.addf %69, %71 : vector<16x64xf32>
      scf.yield %58, %67, %72 : vector<16x1xf32>, vector<16x1xf32>, vector<16x64xf32>
    }
    %43 = tpu.reciprocal %42#1 {approx = true} : vector<16x1xf32> -> vector<16x1xf32>
    %44 = vector.broadcast %43 : vector<16x1xf32> to vector<16x64xf32>
    %45 = arith.mulf %42#2, %44 : vector<16x64xf32>
    %c0_16 = arith.constant 0 : index
    %c0_17 = arith.constant 0 : index
    %c0_18 = arith.constant 0 : index
    %46 = vector.load %arg4[%c0_16, %c0_17, %c0_18] : memref<1x16x192xf32, #tpu.memory_space<vmem>>, vector<1x16x64xf32>
    %47 = vector.shape_cast %46 : vector<1x16x64xf32> to vector<16x64xf32>
    %48 = vector.shape_cast %45 : vector<16x64xf32> to vector<1x16x64xf32>
    tpu.vector_store %arg4[%c0_16, %c0_17, %c0_18], %48 {strides = array<i32>} : memref<1x16x192xf32, #tpu.memory_space<vmem>>, vector<1x16x64xf32>,
    return
  }
  func.func @transform_0(%arg0: i32, %arg1: i32) -> (i32, i32, i32) {
    %c0_i32 = arith.constant 0 : i32
    %c0_i32_0 = arith.constant 0 : i32
    return %arg0, %arg1, %c0_i32 : i32, i32, i32
  }
  func.func @transform_1(%arg0: i32, %arg1: i32) -> (i32, i32) {
    %c0_i32 = arith.constant 0 : i32
    %c0_i32_0 = arith.constant 0 : i32
    %c0_i32_1 = arith.constant 0 : i32
    return %c0_i32, %c0_i32_0 : i32, i32
  }
  func.func @transform_2(%arg0: i32, %arg1: i32) -> (i32, i32, i32) {
    %c0_i32 = arith.constant 0 : i32
    %c0_i32_0 = arith.constant 0 : i32
    return %arg0, %arg1, %c0_i32 : i32, i32, i32
  }
}

</mosaic_0001>

<bundles_post_ra>
// kernel: tpu_custom_call.1
= control target key start
LH: loop header
LB: loop body
LE: loop exit
PB: predicated region body
PF: predicated region fallthrough
CT: control target
= control target key end

     0   :  { %7 = vsyncpa [#allocation5], 0  ;;  %s2151_s0 = inlined_call_operand.vmem [shape: f32[2,64,512], index: 0, kind: input, shape index: {}]   ;;  %s2152_s1 = inlined_call_operand.vmem [shape: bf16[512,192], index: 1, kind: input, shape index: {}]   ;;  %s2153_s2 = inlined_call_operand.hbm [shape: f32[2,64,192], index: 2, kind: output, shape index: {}]  }
   0x1   :  { %9 = vsyncpa [#allocation5 + $0x1], 0  ;;  %s1700_s9 = smov 0   ;;  %s1702_s10 = smov 0  }
   0x2   :  { %s1704_s11 = smov 0   ;;  %s1706_s12 = smov 0  }
   0x3   :  { %s1708_s13 = smov 0   ;;  %s1710_s14 = smov 0  }
   0x4   :  { %s1712_s15 = smov 0   ;;  %s1714_s16 = smov 0  }
   0x5 LB: > { %s1086_s17 = sadd.s32 4294967295, %s1631_s16   ;;  %s1087_s18 = sadd.s32 4294967294, %s1631_s16   ;;  %s1631_s16 = sphi %s1714_s16, %s15_s16   ;;  %s1627_s15 = sphi %s1712_s15, %s2176_s15   ;;  %s1623_s14 = sphi %s1710_s14, %s2175_s14   ;;  %s1619_s13 = sphi %s1708_s13, %s2174_s13   ;;  %s1615_s12 = sphi %s1706_s12, %s2173_s12   ;;  %s1611_s11 = sphi %s1704_s11, %s2172_s11   ;;  %s1607_s10 = sphi %s1702_s10, %s2171_s10   ;;  %s1603_s9 = sphi %s1700_s9, %s2170_s9  }
   0x6   : > { %s24_s19 = sadd.s32 1, %s1623_s14  ;;  %s27_s20 = sadd.s32 1, %s1627_s15 }
   0x7   : > { %p25_p0 = scmp.ge.s32.totalorder %s24_s19, 4  ;;  %p95_p1 = scmp.ne.s32.totalorder %s1611_s11, %s1607_s10 }
   0x8   : > { %p96_p2 = scmp.eq.s32.totalorder %s1086_s17, 7  ;;  %p101_p5 = scmp.ne.s32.totalorder %s1607_s10, %s1603_s9 }
   0x9   : > { %s2178_s19 = smov (%p25_p0, %s24_s19), 0  ;;  %s2180_s20 = smov (!%p25_p0, %s27_s20), %s1627_s15 }
   0xa   : > { %s81_s21 = ssub.s32 %s1623_s14, %s2178_s19  ;;  %p1751_p3 = por %p96_p2, %p95_p1 }
   0xb   : > { %p29_p4 = scmp.ge.s32.totalorder %s2180_s20, 2  ;;  %p102_p6 = scmp.eq.s32.totalorder %s1087_s18, 7 }
   0xc   : > { %p1090_p7 = scmp.ge.s32.totalorder %s1631_s16, 1  ;;  %p137_p9 = scmp.lt.s32.totalorder %s1631_s16, 9 }
   0xd   : > { %s2182_s20 = smov (%p29_p4, %s2180_s20), 0  ;;  %p1760_p8 = por %p102_p6, %p101_p5 }
   0xe   : > { %s80_s24 = ssub.s32 %s1627_s15, %s2182_s20  ;;  %s85_s25 = sadd.s32 1, %s1611_s11 }
   0xf   : > { %s82_s26 = sor.u32 %s81_s21, %s80_s24  ;;  %p138_p10 = pnand %p1090_p7, %p137_p9 }
  0x10   : > { %p83_p11 = scmp.eq.s32.totalorder %s82_s26, 0  ;;  %v1381_v0 = vld [vmem:[%s2152_s1 + $0x4] ss:$8 sps:$4 sm:$0xff] (!%p138_p10)   ;;  %v1385_v2 = vld [vmem:[%s2152_s1] ss:$8 sps:$4 sm:$0xff] (!%p138_p10)   ;;  %s1092_s29 = sshll.u32 (!%p138_p10), %s1615_s12, 1 }
  0x11   : > { %141 = sbr.rel (%p138_p10) target bundleno = 1651 (0x673), region = 28  ;;  %v1383_v1 = vld [vmem:[%s2152_s1 + $0x104] ss:$8 sps:$4 sm:$0xff] (!%p138_p10)   ;;  %574 = vmatprep.subr.bf16.mxu1 (!%p138_p10), %v1381_v0  ;;  %v1386_v3 = vld [vmem:[%s2152_s1 + $0x100] ss:$8 sps:$4 sm:$0xff] (!%p138_p10)   ;;  %p165_p12 = scmp.lt.s32.totalorder (!%p138_p10), %s1619_s13, 1 }
  0x12   : > { %s1769_s27 = scalar_select %p83_p11, %s1611_s11, %s85_s25  }
  0x13   : > { %617 = vmatprep.subr.bf16.mxu0 (!%p138_p10), %v1383_v1  ;;  %v1387_v4 = vld [vmem:[%s2152_s1 + $0x14] ss:$8 sps:$4 sm:$0xff] (!%p138_p10)   ;;  %575 = vmatpush1.bf16.msra.mxu1 (!%p138_p10), %v1385_v2  ;;  %v1391_v6 = vld [vmem:[%s2152_s1 + $0x10] ss:$8 sps:$4 sm:$0xff] (!%p138_p10)   ;;  %v1393_v8 = vld [vmem:[%s2152_s1 + $0x24] ss:$8 sps:$4 sm:$0xff] (!%p138_p10)  }
  0x14   : > { %618 = vmatpush1.bf16.msra.mxu0 (!%p138_p10), %v1386_v3  ;;  %v1389_v5 = vld [vmem:[%s2152_s1 + $0x114] ss:$8 sps:$4 sm:$0xff] (!%p138_p10)   ;;  %576 = vmatprep.subr.bf16.mxu1 (!%p138_p10), %v1387_v4  ;;  %v1392_v7 = vld [vmem:[%s2152_s1 + $0x110] ss:$8 sps:$4 sm:$0xff] (!%p138_p10)   ;;  %v1395_v9 = vld [vmem:[%s2152_s1 + $0x124] ss:$8 sps:$4 sm:$0xff] (!%p138_p10)  }
  0x15   : > { %619 = vmatprep.subr.bf16.mxu0 (!%p138_p10), %v1389_v5  ;;  %v1397_v10 = vld [vmem:[%s2152_s1 + $0x20] ss:$8 sps:$4 sm:$0xff] (!%p138_p10)   ;;  %v1399_v12 = vld [vmem:[%s2152_s1 + $0x34] ss:$8 sps:$4 sm:$0xff] (!%p138_p10)   ;;  %v1403_v14 = vld [vmem:[%s2152_s1 + $0x30] ss:$8 sps:$4 sm:$0xff] (!%p138_p10)  }
  0x16   : > { %v1398_v11 = vld [vmem:[%s2152_s1 + $0x120] ss:$8 sps:$4 sm:$0xff] (!%p138_p10)   ;;  %v1401_v13 = vld [vmem:[%s2152_s1 + $0x134] ss:$8 sps:$4 sm:$0xff] (!%p138_p10)   ;;  %v1404_v15 = vld [vmem:[%s2152_s1 + $0x130] ss:$8 sps:$4 sm:$0xff] (!%p138_p10)  }
  0x17   : > { %577 = vmatpush1.bf16.msra.mxu1 (!%p138_p10), %v1391_v6  ;;  %v1405_v16 = vld [vmem:[%s2152_s1 + $0x44] ss:$8 sps:$4 sm:$0xff] (!%p138_p10)   ;;  %v1409_v18 = vld [vmem:[%s2152_s1 + $0x40] ss:$8 sps:$4 sm:$0xff] (!%p138_p10)   ;;  %v1411_v20 = vld [vmem:[%s2152_s1 + $0x54] ss:$8 sps:$4 sm:$0xff] (!%p138_p10)  }
  0x18   : > { %620 = vmatpush1.bf16.msra.mxu0 %v1392_v7  ;;  %578 = vmatprep.subr.bf16.mxu1 %v1393_v8  ;;  %v1407_v17 = vld [vmem:[%s2152_s1 + $0x144] ss:$8 sps:$4 sm:$0xff]   ;;  %v1410_v19 = vld [vmem:[%s2152_s1 + $0x140] ss:$8 sps:$4 sm:$0xff]   ;;  %v1413_v21 = vld [vmem:[%s2152_s1 + $0x154] ss:$8 sps:$4 sm:$0xff]  }
  0x19   : > { %621 = vmatprep.subr.bf16.mxu0 %v1395_v9  ;;  %v1415_v22 = vld [vmem:[%s2152_s1 + $0x50] ss:$8 sps:$4 sm:$0xff]   ;;  %v1417_v24 = vld [vmem:[%s2152_s1 + $0x64] ss:$8 sps:$4 sm:$0xff]   ;;  %p167_p13 = scmp.lt.s32.totalorder %s1092_s29, 7  ;;  %s161_s7 = sand.u32 1, %s1607_s10  }
  0x1a   : > { %v1416_v23 = vld [vmem:[%s2152_s1 + $0x150] ss:$8 sps:$4 sm:$0xff]   ;;  %v1419_v25 = vld [vmem:[%s2152_s1 + $0x164] ss:$8 sps:$4 sm:$0xff]   ;;  %v1421_v26 = vld [vmem:[%s2152_s1 + $0x60] ss:$8 sps:$4 sm:$0xff]  }
  0x1b   : > { %579 = vmatpush1.bf16.msra.mxu1 %v1397_v10  ;;  %v1422_v27 = vld [vmem:[%s2152_s1 + $0x160] ss:$8 sps:$4 sm:$0xff]   ;;  %v1423_v28 = vld [vmem:[%s2152_s1 + $0x74] ss:$8 sps:$4 sm:$0xff]   ;;  %s166_s30 = scalar_select %p165_p12, %s1619_s13, 1  ;;  %vm1678_vm0 = vmmov 0  }
  0x1c   : > { %622 = vmatpush1.bf16.msra.mxu0 %v1398_v11  ;;  %580 = vmatprep.subr.bf16.mxu1 %v1399_v12  ;;  %v1425_v29 = vld [vmem:[%s2152_s1 + $0x174] ss:$8 sps:$4 sm:$0xff]   ;;  %s2184_s29 = smov (!%p167_p13, %s1092_s29), 7  ;;  %v1427_v30 = vld [vmem:[%s2152_s1 + $0x70] ss:$8 sps:$4 sm:$0xff]   ;;  %v1677_v12 = vmov 0.0  }
  0x1d   : > { %623 = vmatprep.subr.bf16.mxu0 %v1401_v13  ;;  %v1428_v31 = vld [vmem:[%s2152_s1 + $0x170] ss:$8 sps:$4 sm:$0xff]   ;;  %v1429_v32 = vld [vmem:[%s2152_s1 + $0x84] ss:$8 sps:$4 sm:$0xff]   ;;  %s1093_s21 = sshll.u32 %s2184_s29, 2  ;;  %s1094_s24 = sshll.u32 %s166_s30, 5 }
  0x1e   : > { %v1431_v33 = vld [vmem:[%s2152_s1 + $0x184] ss:$8 sps:$4 sm:$0xff]   ;;  %v1433_v34 = vld [vmem:[%s2152_s1 + $0x80] ss:$8 sps:$4 sm:$0xff]   ;;  %v1435_v36 = vld [vmem:[%s2152_s1 + $0x94] ss:$8 sps:$4 sm:$0xff]   ;;  %s171_s29 = sadd.s32 %s1094_s24, %s1093_s21 }
  0x1f   : > { %581 = vmatpush1.bf16.msra.mxu1 %v1403_v14  ;;  %v1434_v35 = vld [vmem:[%s2152_s1 + $0x180] ss:$8 sps:$4 sm:$0xff]   ;;  %v1437_v37 = vld [vmem:[%s2152_s1 + $0x194] ss:$8 sps:$4 sm:$0xff]   ;;  %v1439_v38 = vld [vmem:[%s2152_s1 + $0x90] ss:$8 sps:$4 sm:$0xff]  }
  0x20   : > { %624 = vmatpush1.bf16.msra.mxu0 %v1404_v15  ;;  %582 = vmatprep.subr.bf16.mxu1 %v1405_v16  ;;  %v1440_v39 = vld [vmem:[%s2152_s1 + $0x190] ss:$8 sps:$4 sm:$0xff]   ;;  %v1441_v40 = vld [vmem:[%s2152_s1 + $0xa4] ss:$8 sps:$4 sm:$0xff]   ;;  %s1095_s28 = sshll.u32 %s171_s29, 3  ;;  %s1096_s30 = sshll.u32 %s1615_s12, 4 }
  0x21   : > { %625 = vmatprep.subr.bf16.mxu0 %v1407_v17  ;;  %v1443_v41 = vld [vmem:[%s2152_s1 + $0x1a4] ss:$8 sps:$4 sm:$0xff]   ;;  %v1445_v42 = vld [vmem:[%s2152_s1 + $0xa0] ss:$8 sps:$4 sm:$0xff]   ;;  %s1909_s8 = scalar_lea.vmem %s2151_s0, %s1095_s28  ;;  %v1447_v44 = vld [vmem:[%s2152_s1 + $0xb4] ss:$8 sps:$4 sm:$0xff]  }
  0x22   : > { %v1446_v43 = vld [vmem:[%s2152_s1 + $0x1a0] ss:$8 sps:$4 sm:$0xff]   ;;  %v1449_v45 = vld [vmem:[%s2152_s1 + $0x1b4] ss:$8 sps:$4 sm:$0xff]   ;;  %v1451_v50 = vld [vmem:[%s2152_s1 + $0xb0] ss:$8 sps:$4 sm:$0xff]  }
  0x23   : > { %583 = vmatpush1.bf16.msra.mxu1 %v1409_v18  ;;  %v179_v46 = vld [vmem:[%s1909_s8 + $0x8] sm:$0xff]  ;;  %v181_v48 = vld [vmem:[%s1909_s8 + $0x18] sm:$0xff]  ;;  %v178_v6 = vld [vmem:[%s1909_s8] sm:$0xff]  ;;  %s1091_s29 = sshll.u32 %s161_s7, 5  ;;  %vm675_vm1 = vcmask 1048064   ;;  %vm670_vm2 = vcmask 523264  }
  0x24   : > { %626 = vmatpush1.bf16.msra.mxu0 %v1410_v19  ;;  %584 = vmatprep.subr.bf16.mxu1 %v1411_v20  ;;  %v183_v47 = vld [vmem:[%s1909_s8 + $0x28] sm:$0xff]  ;;  %v185_v49 = vld [vmem:[%s1909_s8 + $0x38] sm:$0xff]  ;;  %v182_v7 = vld [vmem:[%s1909_s8 + $0x20] sm:$0xff]  ;;  %s1986_s18 = scalar_lea.vmem [#allocation4], %s1091_s29  ;;  %s1679_s25 = smov 64   ;;  %vm739_vm4 = vcmask 130048  }
  0x25   : > { %627 = vmatprep.subr.bf16.mxu0 %v1413_v21  ;;  %v1452_v51 = vld [vmem:[%s2152_s1 + $0x1b0] ss:$8 sps:$4 sm:$0xff]   ;;  %v187_v52 = vpack.c.bf16 %v183_v47, %v179_v46  ;;  %v189_v53 = vpack.c.bf16 %v185_v49, %v181_v48  ;;  %v1453_v54 = vld [vmem:[%s2152_s1 + $0xc4] ss:$8 sps:$4 sm:$0xff]   ;;  %v1457_v56 = vld [vmem:[%s2152_s1 + $0xc0] ss:$8 sps:$4 sm:$0xff]   ;;  %v186_v10 = vpack.c.bf16 %v182_v7, %v178_v6 }
  0x26   : > { %v1455_v55 = vld [vmem:[%s2152_s1 + $0x1c4] ss:$8 sps:$4 sm:$0xff]   ;;  %v1458_v57 = vld [vmem:[%s2152_s1 + $0x1c0] ss:$8 sps:$4 sm:$0xff]   ;;  %v1459_v58 = vld [vmem:[%s2152_s1 + $0xd4] ss:$8 sps:$4 sm:$0xff]  }
  0x27   : > { %585 = vmatpush1.bf16.msra.mxu1 %v1415_v22  ;;  %606 = vmatprep.mubr.bf16.mxu1 %v187_v52  ;;  %v1461_v59 = vld [vmem:[%s2152_s1 + $0x1d4] ss:$8 sps:$4 sm:$0xff]   ;;  %v1463_v60 = vld [vmem:[%s2152_s1 + $0xd0] ss:$8 sps:$4 sm:$0xff]   ;;  %v1465_v62 = vld [vmem:[%s2152_s1 + $0xe4] ss:$8 sps:$4 sm:$0xff]  }
  0x28   : > { %628 = vmatpush1.bf16.msra.mxu0 %v1416_v23  ;;  %586 = vmatprep.subr.bf16.mxu1 %v1417_v24  ;;  %v1464_v61 = vld [vmem:[%s2152_s1 + $0x1d0] ss:$8 sps:$4 sm:$0xff]   ;;  %v1467_v63 = vld [vmem:[%s2152_s1 + $0x1e4] ss:$8 sps:$4 sm:$0xff]   ;;  %v1469_v0 = vld [vmem:[%s2152_s1 + $0xe0] ss:$8 sps:$4 sm:$0xff]  }
  0x29   : > { %629 = vmatprep.subr.bf16.mxu0 %v1419_v25  ;;  %649 = vmatprep.mubr.bf16.mxu0 %v189_v53  ;;  %v1470_v1 = vld [vmem:[%s2152_s1 + $0x1e0] ss:$8 sps:$4 sm:$0xff]   ;;  %v1471_v2 = vld [vmem:[%s2152_s1 + $0xf4] ss:$8 sps:$4 sm:$0xff]   ;;  %v1475_v4 = vld [vmem:[%s2152_s1 + $0xf0] ss:$8 sps:$4 sm:$0xff]  }
  0x2a   : > { %v1473_v3 = vld [vmem:[%s2152_s1 + $0x1f4] ss:$8 sps:$4 sm:$0xff]   ;;  %v1476_v5 = vld [vmem:[%s2152_s1 + $0x1f0] ss:$8 sps:$4 sm:$0xff]   ;;  %p1165_p0 = scmp.le.s32.totalorder %s1615_s12, 0 }
  0x2b   : > { %587 = vmatpush1.bf16.msra.mxu1 %v1421_v26  ;;  %v180_v8 = vld [vmem:[%s1909_s8 + $0x10] sm:$0xff]  ;;  %s2029_s3 = smov (!%p1165_p0), 0  }
  0x2c   : > { %630 = vmatpush1.bf16.msra.mxu0 %v1422_v27  ;;  %588 = vmatprep.subr.bf16.mxu1 %v1423_v28  ;;  %v184_v9 = vld [vmem:[%s1909_s8 + $0x30] sm:$0xff]  ;;  %s1983_s8 = sshra.s32 %s1096_s30, 4 }
  0x2d   : > { %631 = vmatprep.subr.bf16.mxu0 %v1425_v29  ;;  %v188_v11 = vpack.c.bf16 %v184_v9, %v180_v8  ;;  %s1161_s17 = sshll.u32 %s1983_s8, 3 }
  0x2e   : > { %s673_s26 = scalar_lea.vmem [#allocation3], %s1161_s17  ;;  %s669_s28 = scalar_lea.vmem [#allocation2], %s1161_s17 }
  0x2f   : > { %589 = vmatpush1.bf16.msra.mxu1 %v1427_v30 }
  0x30   : > { %632 = vmatpush1.bf16.msra.mxu0 %v1428_v31  ;;  %590 = vmatprep.subr.bf16.mxu1 %v1429_v32  ;;  %v730_v32 = vlaneseq }
  0x31   : > { %633 = vmatprep.subr.bf16.mxu0 %v1431_v33 }
  0x32   : > { %v731_v33 = vshrl.u32 %v730_v32, 7 }
  0x33   : > { %591 = vmatpush1.bf16.msra.mxu1 %v1433_v34  ;;  %v734_v34 = vand.u32 127, %v730_v32 }
  0x34   : > { %634 = vmatpush1.bf16.msra.mxu0 %v1434_v35  ;;  %592 = vmatprep.subr.bf16.mxu1 %v1435_v36  ;;  %v732_v35 = vadd.s32 8, %v731_v33 }
  0x35   : > { %635 = vmatprep.subr.bf16.mxu0 %v1437_v37  ;;  %vm735_vm3 = vcmp.ge.s32.totalorder %v731_v33, %v734_v34 }
  0x36   : > { %vm736_vm5 = vcmp.ge.s32.totalorder %v732_v35, %v734_v34 }
  0x37   : > { %593 = vmatpush1.bf16.msra.mxu1 %v1439_v38 }
  0x38   : > { %636 = vmatpush1.bf16.msra.mxu0 %v1440_v39  ;;  %594 = vmatprep.subr.bf16.mxu1 %v1441_v40 }
  0x39   : > { %637 = vmatprep.subr.bf16.mxu0 %v1443_v41 }
  0x3b   : > { %595 = vmatpush1.bf16.msra.mxu1 %v1445_v42 }
  0x3c   : > { %638 = vmatpush1.bf16.msra.mxu0 %v1446_v43  ;;  %596 = vmatprep.subr.bf16.mxu1 %v1447_v44 }
  0x3d   : > { %639 = vmatprep.subr.bf16.mxu0 %v1449_v45 }
  0x3f   : > { %597 = vmatpush1.bf16.msra.mxu1 %v1451_v50 }
  0x40   : > { %640 = vmatpush1.bf16.msra.mxu0 %v1452_v51  ;;  %598 = vmatprep.subr.bf16.mxu1 %v1453_v54 }
  0x41   : > { %641 = vmatprep.subr.bf16.mxu0 %v1455_v55 }
  0x43   : > { %599 = vmatpush1.bf16.msra.mxu1 %v1457_v56 }
  0x44   : > { %642 = vmatpush1.bf16.msra.mxu0 %v1458_v57  ;;  %600 = vmatprep.subr.bf16.mxu1 %v1459_v58 }
  0x45   : > { %643 = vmatprep.subr.bf16.mxu0 %v1461_v59 }
  0x47   : > { %601 = vmatpush1.bf16.msra.mxu1 %v1463_v60 }
  0x48   : > { %644 = vmatpush1.bf16.msra.mxu0 %v1464_v61  ;;  %602 = vmatprep.subr.bf16.mxu1 %v1465_v62 }
  0x49   : > { %645 = vmatprep.subr.bf16.mxu0 %v1467_v63 }
  0x4b   : > { %603 = vmatpush1.bf16.msra.mxu1 %v1469_v0 }
  0x4c   : > { %646 = vmatpush1.bf16.msra.mxu0 %v1470_v1  ;;  %604 = vmatprep.subr.bf16.mxu1 %v1471_v2 }
  0x4d   : > { %647 = vmatprep.subr.bf16.mxu0 %v1473_v3 }
  0x4f   : > { %605 = vmatpush1.bf16.msra.mxu1 %v1475_v4 }
  0x50   : > { %648 = vmatpush1.bf16.msra.mxu0 %v1476_v5  ;;  %1193 = vmatprep.subr.bf16.mxu1 %v1677_v12 }
  0x51   : > { %1187 = vmatprep.subr.bf16.mxu0 %v1677_v12 }
  0x52   : > { %607 = vmatmul.mubr.bf16.vlgmr.msra.gmra.mrb[0].mxu1 %v186_v10 }
  0x53   : > { %650 = vmatmul.mubr.bf16.vlgmr.msra.gmra.mrb[0].mxu0 %v188_v11  ;;  %1195 = vmatprep.mubr.msk.bf16.mxu1 %vm1678_vm0, %v1677_v12 }
  0x54   : > { %1189 = vmatprep.mubr.msk.bf16.mxu0 %vm1678_vm0, %v1677_v12 }
 0x125   : > { %v608_v13 = vpop.f32.mrb[0].mxu1 }
 0x126   : > { %v651_v14 = vpop.f32.mrb[0].mxu0  ;;  %v610_v16 = vpop.f32.mrb[1].mxu1 }
 0x127   : > { %v652_v15 = vadd.f32 %v651_v14, %v608_v13  ;;  %v653_v17 = vpop.f32.mrb[1].mxu0  ;;  %v612_v19 = vpop.f32.mrb[2].mxu1 }
 0x128   : > { %v654_v18 = vadd.f32 %v653_v17, %v610_v16  ;;  %v655_v20 = vpop.f32.mrb[2].mxu0  ;;  %v614_v22 = vpop.f32.mrb[3].mxu1 }
 0x129   : > { %676 = vst.msk [vmem:[%s1986_s18] sm:$0xff] %vm675_vm1, %v652_v15  ;;  %v656_v21 = vadd.f32 %v655_v20, %v612_v19  ;;  %v657_v23 = vpop.f32.mrb[3].mxu0  ;;  %v680_v25 = vmul.f32 0.125, %v652_v15 }
 0x12a   : > { %678 = vst.msk [vmem:[%s1986_s18 + $0x8] sm:$0xff] %vm670_vm2, %v654_v18  ;;  %v658_v24 = vadd.f32 %v657_v23, %v614_v22 }
 0x12b   : > { %677 = vst.msk [vmem:[%s1986_s18 + $0x10] sm:$0xff] %vm675_vm1, %v656_v21  ;;  %v681_v26 = vmul.f32 0.125, %v656_v21  ;;  %v660_v27 = vpack.c.bf16 %v656_v21, %v652_v15 }
 0x12c   : > { %v661_v28 = vpack.c.bf16 %v658_v24, %v654_v18  ;;  %679 = vst.msk [vmem:[%s1986_s18 + $0x18] sm:$0xff] %vm670_vm2, %v658_v24 }
 0x12d   : > { %v1996_v29 = vpack.c.bf16 %v681_v26, %v680_v25  ;;  %663 = vrot.lane.b32.xlu0 %v660_v27, %s1679_s25 }
 0x12e   : > { %1194 = vmatpush3.bf16.msra.mxu1 %v661_v28  ;;  %674 = vst.msk [vmem:[%s673_s26] sm:$0xff] %vm670_vm2, %v661_v28 }
 0x19f   : > { %v664_v30 = vpop.permute.xlu0 %663 }
 0x1a0   : > { %671 = vst.msk [vmem:[%s669_s28] sm:$0xff] %vm670_vm2, %v664_v30  ;;  %v687_v31 = vsel %vm670_vm2, %v664_v30, 0 }
 0x1a1   : > { %1188 = vmatpush3.bf16.xpose.msra.mxu0 %v687_v31 }
 0x1a8   : > { %1190 = vmatmul.mubr.msk.bf16.vlgmr.msra.gmra.mrb[4].mxu0 %vm670_vm2, %v1996_v29 }
 0x27b   : > { %v723_v36 = vpop.f32.mrb[4].mxu0 }
 0x27c   : > { %v737_v37 = vsel %vm735_vm3, %v723_v36, -1e+30  ;;  %v1191_v38 = vpop.f32.mrb[5].mxu0 }
 0x27d   : > { %v726_v39 = vpop.f32.mrb[6].mxu0  ;;  %v740_v40 = vsel %vm739_vm4, %v737_v37, -inf }
 0x27e   : > { %v738_v41 = vsel %vm736_vm5, %v726_v39, -1e+30  ;;  %741 = vmax.xlane.f32.xlu0 %v740_v40  ;;  %v1192_v42 = vpop.f32.mrb[7].mxu0 }
 0x27f   : > { %v743_v43 = vsel %vm739_vm4, %v738_v41, -inf }
 0x280   : > { %744 = vmax.xlane.f32.xlu1 %v743_v43 }
 0x30b   : > { %v742_v44 = vpop.xlane.xlu0 %741  }
 0x30c   : > { %v746_v45 = vsub.f32 %v737_v37, %v742_v44 }
 0x30d   : > { %v745_v46 = vpop.xlane.xlu1 %744  }
 0x30e   : > { %v748_v47 = vmul.f32 1.442695, %v746_v45  ;;  %v747_v48 = vsub.f32 %v738_v41, %v745_v46 }
 0x310   : > { %1477 = vpow2.f32 %v748_v47  ;;  %v750_v49 = vmul.f32 1.442695, %v747_v48 }
 0x312   : > { %1479 = vpow2.f32 %v750_v49 }
 0x31a   : > { %v1478_v50 = vpop.eup %1477 }
 0x31b   : > { %v752_v51 = vsel %vm739_vm4, %v1478_v50, 0.0 }
 0x31c   : > { %v1480_v52 = vpop.eup %1479  ;;  %753 = vadd.xlane.f32.xlu1 %v752_v51 }
 0x31d   : > { %v758_v53 = vpack.c.bf16 %v1480_v52, %v1478_v50  ;;  %v755_v54 = vsel %vm739_vm4, %v1480_v52, 0.0 }
 0x31f   : > { %1196 = vmatmul.mubr.msk.bf16.vlgmr.msra.gmra.mrb[4].mxu1 %vm739_vm4, %v758_v53 }
 0x320   : > { %756 = vadd.xlane.f32.xlu1 %v755_v54 }
 0x3a9   : > { %v754_v55 = vpop.xlane.xlu1 %753  }
 0x3aa   : > { %v2159_v0 = vmov %v754_v55 }
 0x3ad   : > { %v757_v56 = vpop.xlane.xlu1 %756  }
 0x3ae   : > { %v2158_v63 = vmov %v757_v56 }
 0x3ef   : > { %1039 = sbr.rel (%p1165_p0) target bundleno = 1622 (0x656), region = 68 }
 0x3f2   : > { %v796_v57 = vpop.f32.mrb[4].mxu1  }
 0x3f3   : > { %v1197_v58 = vpop.f32.mrb[5].mxu1  ;;  %v2157_v62 = vmov %v796_v57 }
 0x3f4   : > { %v799_v59 = vpop.f32.mrb[6].mxu1  }
 0x3f5   : > { %v1198_v60 = vpop.f32.mrb[7].mxu1  ;;  %v2156_v61 = vmov %v799_v59 }
 0x3f6 LB: >> { %v1680_v1 = vmov 0.0   ;;  %vm1681_vm6 = vmmov 0   ;;  %s1166_s4 = sshll.u32 %s1659_s3, 4  ;;  %s806_s3 = sadd.s32 1, %s1659_s3   ;;  %s1659_s3 = sphi %s2029_s3, %s806_s3   ;;  %v1655_v44 = vphi %v742_v44, %v2165_v44   ;;  %v1651_v46 = vphi %v745_v46, %v2164_v46   ;;  %v1647_v55 = vphi %v754_v55, %v2163_v55   ;;  %v1643_v56 = vphi %v757_v56, %v2162_v56   ;;  %v1639_v57 = vphi %v796_v57, %v2161_v57   ;;  %v1635_v59 = vphi %v799_v59, %v2160_v59  }
 0x3f7   : >> { %1199 = vmatprep.subr.bf16.mxu0 %v1680_v1  ;;  %1201 = vmatprep.mubr.msk.bf16.mxu0 %vm1681_vm6, %v1680_v1  ;;  %s816_s21 = sshra.s32 %s1166_s4, 4  ;;  %p805_p1 = scmp.ge.s32.totalorder %s806_s3, %s1615_s12 }
 0x3f8   : >> { %1205 = vmatprep.subr.bf16.mxu1 %v1680_v1  ;;  %1207 = vmatprep.mubr.msk.bf16.mxu1 %vm1681_vm6, %v1680_v1  ;;  %s1167_s24 = sshll.u32 %s816_s21, 3 }
 0x3f9   : >> { %s819_s5 = scalar_lea.vmem [#allocation2], %s1167_s24  ;;  %s822_s6 = scalar_lea.vmem [#allocation3], %s1167_s24 }
 0x3fa   : >> { %v820_v2 = vld [vmem:[%s819_s5] sm:$0xff] }
 0x3fb   : >> { %v825_v3 = vsel %vm670_vm2, %v820_v2, 0  ;;  %v823_v10 = vld [vmem:[%s822_s6] sm:$0xff] }
 0x3fc   : >> { %1200 = vmatpush3.bf16.xpose.msra.mxu0 %v825_v3  ;;  %1206 = vmatpush3.bf16.msra.mxu1 %v823_v10 }
 0x403   : >> { %1202 = vmatmul.mubr.msk.bf16.vlgmr.msra.gmra.mrb[0].mxu0 %vm670_vm2, %v1996_v29 }
 0x4d6   : >> { %v861_v4 = vpop.f32.mrb[0].mxu0 }
 0x4d7   : >> { %v1203_v5 = vpop.f32.mrb[1].mxu0  ;;  %v868_v6 = vsel %vm739_vm4, %v861_v4, -inf }
 0x4d8   : >> { %869 = vmax.xlane.f32.xlu0 %v868_v6  ;;  %v864_v7 = vpop.f32.mrb[2].mxu0 }
 0x4d9   : >> { %v1204_v8 = vpop.f32.mrb[3].mxu0  ;;  %v871_v9 = vsel %vm739_vm4, %v864_v7, -inf }
 0x4dc   : >> { %872 = vmax.xlane.f32.xlu0 %v871_v9 }
 0x565   : >> { %v870_v11 = vpop.xlane.xlu0 %869 }
 0x566   : >> { %v874_v12 = vmax.f32 %v1655_v44, %v870_v11  }
 0x568   : >> { %v876_v13 = vsub.f32 %v1655_v44, %v874_v12  ;;  %v882_v14 = vsub.f32 %v861_v4, %v874_v12 }
 0x569   : >> { %v873_v15 = vpop.xlane.xlu0 %872 }
 0x56a   : >> { %v884_v16 = vmul.f32 1.442695, %v882_v14  ;;  %v875_v17 = vmax.f32 %v1651_v46, %v873_v15   ;;  %v878_v26 = vmul.f32 1.442695, %v876_v13 }
 0x56c   : >> { %v877_v18 = vsub.f32 %v1651_v46, %v875_v17  ;;  %v883_v19 = vsub.f32 %v864_v7, %v875_v17  ;;  %1481 = vpow2.f32 %v884_v16  ;;  %v2164_v46 = vmov %v875_v17 }
 0x56e   : >> { %v886_v20 = vmul.f32 1.442695, %v883_v19  ;;  %v880_v27 = vmul.f32 1.442695, %v877_v18 }
 0x570   : >> { %1483 = vpow2.f32 %v886_v20 }
 0x571   : >> { %1485 = vpow2.f32 %v878_v26 }
 0x572   : >> { %1487 = vpow2.f32 %v880_v27 }
 0x576   : >> { %v1482_v21 = vpop.eup %1481 }
 0x577   : >> { %v890_v22 = vsel %vm739_vm4, %v1482_v21, 0.0 }
 0x578   : >> { %891 = vadd.xlane.f32.xlu1 %v890_v22 }
 0x57a   : >> { %v1484_v23 = vpop.eup %1483 }
 0x57b   : >> { %v893_v24 = vsel %vm739_vm4, %v1484_v23, 0.0  ;;  %v900_v25 = vpack.c.bf16 %v1484_v23, %v1482_v21  ;;  %v1486_v28 = vpop.eup %1485 }
 0x57c   : >> { %894 = vadd.xlane.f32.xlu1 %v893_v24  ;;  %v888_v30 = vmul.f32 %v1647_v55, %v1486_v28  ;;  %v1488_v31 = vpop.eup %1487  ;;  %v898_v37 = vmul.f32 %v1639_v57, %v1486_v28 }
 0x57d   : >> { %1208 = vmatmul.mubr.msk.bf16.vlgmr.msra.gmra.mrb[0].mxu1 %vm739_vm4, %v900_v25  ;;  %v889_v34 = vmul.f32 %v1643_v56, %v1488_v31  ;;  %v899_v41 = vmul.f32 %v1635_v59, %v1488_v31 }
 0x605   : >> { %v892_v32 = vpop.xlane.xlu1 %891 }
 0x606   : >> { %v896_v33 = vadd.f32 %v892_v32, %v888_v30  }
 0x608   : >> { %v2163_v55 = vmov %v896_v33  ;;  %v2169_v0 = vmov (%p805_p1), %v896_v33 }
 0x609   : >> { %v895_v35 = vpop.xlane.xlu1 %894 }
 0x60a   : >> { %v897_v36 = vadd.f32 %v895_v35, %v889_v34  }
 0x60c   : >> { %v2162_v56 = vmov %v897_v36  ;;  %v2168_v63 = vmov (%p805_p1), %v897_v36 }
 0x64f   : > { %808 = sbr.rel (!%p805_p1) target bundleno = 1014 (0x3f6), region = 74 }
 0x650   : >> { %v938_v38 = vpop.f32.mrb[0].mxu1 }
 0x651   : >> { %v945_v39 = vadd.f32 %v938_v38, %v898_v37   ;;  %v1209_v40 = vpop.f32.mrb[1].mxu1 }
 0x652   : >> { %v941_v42 = vpop.f32.mrb[2].mxu1 }
 0x653   : >> { %v946_v43 = vadd.f32 %v941_v42, %v899_v41   ;;  %v1210_v44 = vpop.f32.mrb[3].mxu1  ;;  %v2161_v57 = vmov %v945_v39  ;;  %v2167_v62 = vmov (%p805_p1), %v945_v39 }
 0x654   : >> { %v2165_v44 = vmov %v874_v12 }
 0x655   : >> { %v2160_v59 = vmov %v946_v43  ;;  %v2166_v61 = vmov (%p805_p1), %v946_v43 }
 0x656 PF: > { %1489 = vrcp.f32 %v1675_v0  ;;  %s1178_s30 = sshll.u32 %s1615_s12, 2  ;;  %s1174_s29 = sshll.u32 %s1619_s13, 4  ;;  %v1675_v0 = vphi %v2159_v0, %v2169_v0   ;;  %v1671_v63 = vphi %v2158_v63, %v2168_v63   ;;  %v1667_v62 = vphi %v2157_v62, %v2167_v62   ;;  %v1663_v61 = vphi %v2156_v61, %v2166_v61  }
 0x657   : > { %1491 = vrcp.f32 %v1671_v63  ;;  %s967_s8 = sadd.s32 %s1178_s30, %s1174_s29  ;;  %s970_s17 = sshll.u32 %s1986_s18, 4  ;;  %s2086_s17 = int_to_ptr.vmem [resolvable:$true] %s970_s17 }
 0x658   : > { %s1175_s25 = sshll.u32 %s967_s8, 7  ;;  %s2099_s12 = scalar_lea.sflag [#allocation5], %s161_s7 }
 0x659   : > { %s2091_s3 = scalar_lea.hbm %s2153_s2, %s1175_s25  ;;  %s1493_s13 = scalar_lea.vmem %s2086_s17, 512 }
 0x65a   : > { %p1494_p2 = scmp.ne.s32.totalorder %s2086_s17, %s1493_s13  ;;  %s1682_s4 = smov [#allocation4]  }
 0x65b   : > { %s1497_s21 = sshll.u32 %s1682_s4, 4  ;;  %s1498_s21 = int_to_ptr.vmem [resolvable:$false] %s1497_s21 }
 0x65c   : > { %p1495_p4 = pnand %p1494_p2, %p1751_p3  ;;  %s1499_s24 = scalar_lea.vmem %s1498_s21, 1024 }
 0x65d   : > { %p1500_p6 = scmp.lt.s32.totalorder %s2086_s17, %s1498_s21  ;;  %p1501_p7 = scmp.lt.s32.totalorder %s1499_s24, %s1493_s13 }
 0x65e   : > { %p1496_p5 = pneg %p1495_p4 }
 0x65f   : > { %p1502_p9 = por %p1501_p7, %p1500_p6 }
 0x660   : > { %v1490_v29 = vpop.eup %1489 }
 0x661   : > { %v1492_v45 = vpop.eup %1491  ;;  %v949_v46 = vmul.f32 %v1667_v62, %v1490_v29  ;;  %p1503_p10 = pnand %p1502_p9, %p1496_p5 }
 0x662   : > { %v950_v47 = vmul.f32 %v1663_v61, %v1492_v45 }
 0x663   : > { %951 = vst.msk [vmem:[%s1986_s18] sm:$0xff] %vm670_vm2, %v949_v46 }
 0x664   : > { %952 = vst.msk [vmem:[%s1986_s18 + $0x10] sm:$0xff] %vm670_vm2, %v950_v47 }
 0x665   : > { %1506 = shalt.err (!%p1503_p10)
}
 0x666   : > { %s1507_s7 = scalar_lea.hbm %s2091_s3, 512  ;;  %s1511_s6 = scalar_lea.hbm %s2153_s2, 4096 }
 0x667   : > { %p1508_p11 = scmp.ne.s32.totalorder %s2091_s3, %s1507_s7  ;;  %p1512_p0 = scmp.lt.u32.totalorder %s2091_s3, %s2153_s2 }
 0x668   : > { %p1513_p1 = scmp.lt.u32.totalorder %s1511_s6, %s1507_s7  ;;  %p1515_p4 = scmp.lt.u32.totalorder %s1507_s7, %s2091_s3 }
 0x669   : > { %p1509_p12 = pnand %p1508_p11, %p1751_p3 }
 0x66a   : > { %p1514_p2 = por %p1513_p1, %p1512_p0 }
 0x66b   : > { %p1510_p13 = pneg %p1509_p12 }
 0x66c   : > { %p1516_p5 = por %p1515_p4, %p1514_p2 }
 0x66e   : > { %p1517_p6 = pnand %p1516_p5, %p1510_p13 }
 0x670   : > { %1520 = shalt.err (!%p1517_p6)
}
 0x671   : > { %s1683_s8 = smov 256   ;;  %s1684_s25 = smov 16  }
 0x672   : > { %1215 = dma.vmem_to_hbm [thread:$0]  (%p1751_p3), %s2086_s17, 512, %s2091_s3, %s2099_s12, %s1683_s8, %s1683_s8, %s1684_s25  }
 0x673 PF: > { %p1221_p7 = scmp.ge.s32.totalorder %s1631_s16, 2  ;;  %s985_s26 = sand.u32 1, %s1603_s9  }
 0x674   : > { %s986_s28 = scalar_lea.sflag [#allocation5], %s985_s26 }
 0x675   : > { %p1218_p9 = pnand %p1221_p7, %p1760_p8 }
 0x677   : > { %1598 = dma.done.wait (!%p1218_p9), %s986_s28, 512  }
 0x678   : > { %1600 = vsyncadd (!%p1218_p9), %s986_s28, 4294966784  ;;  %s15_s16 = sadd.s32 1, %s1631_s16   ;;  %s2170_s9 = smov %s1607_s10 }
 0x679   : > { %p12_p10 = scmp.ge.s32.totalorder %s15_s16, 10   ;;  %s2171_s10 = smov %s1611_s11 }
 0x67a   : > { %s2172_s11 = smov %s1769_s27  ;;  %s2173_s12 = smov %s1623_s14 }
 0x67b   : > { %s2174_s13 = smov %s1627_s15  ;;  %s2175_s14 = smov %s2178_s19 }
 0x67c   : > { %s2176_s15 = smov %s2182_s20  ;;  %14 = sbr.rel (!%p12_p10) target bundleno = 5 (0x5), region = 85 }
 0x683   :  { %991 = vsyncpa [#allocation5], 1 }
 0x684   :  { %993 = vsyncpa [#allocation5 + $0x1], 1 }

</bundles_post_ra>
